<compile_context>
chip_gen: v7x
topology: tpu7x:2x2x1
jax: 0.10.0
libtpu: 0.0.40
codegen_flags: <defaults>
</compile_context>

<pallas_src>
import math
from functools import partial

import jax
import jax.numpy as jnp
from jax.experimental import pallas as pl
from jax.experimental.pallas import tpu as pltpu


# ----------------------------------------------------------------------------
# Kernel bodies
# ----------------------------------------------------------------------------
def _logits(q_ref, keys_ref, w1q_ref, w1k_ref, b1_ref, w2_ref, b2_ref,
            tanh_dtype):
    TB, TS, K = keys_ref.shape
    P = w1q_ref.shape[1]
    wdt = w1q_ref.dtype

    # Query half of Linear1 (one small MXU call per tile); fold b1 here so the
    # big (TB*TS, P) tensor only sees a single add below.
    hq = jnp.dot(q_ref[...].astype(wdt), w1q_ref[...],
                 preferred_element_type=jnp.float32)            # (TB, P) f32
    hq = hq + b1_ref[...]                                       # b1 is f32 (1, P)

    # Keys half of Linear1: one MXU call for the whole (TB, TS) tile.
    # TS is a multiple of 8 (or the full S), so the reshapes are views.
    hk = jnp.dot(keys_ref[...].reshape(TB * TS, K).astype(wdt), w1k_ref[...],
                 preferred_element_type=jnp.float32)            # (TB*TS, P) f32

    pre = hk.reshape(TB, TS, P) + hq[:, None, :]                # (TB, TS, P) f32
    h = jnp.tanh(pre.astype(tanh_dtype))                        # EUP (bf16 on v6e/v7x)

    # Final (P -> 1) projection: VPU multiply + XLU lane reduce in f32
    # (cheaper than a wasted (P,1) MXU pass; overlaps with the MXU path).
    logits = jnp.sum(h.astype(jnp.float32) * w2_ref[...], axis=-1)   # (TB, TS)
    return logits + b2_ref[0, 0]


def _bahdanau_kernel(q_ref, keys_ref, w1q_ref, w1k_ref, b1_ref, w2_ref,
                     b2_ref, out_ref, *, tanh_dtype):
    out_ref[...] = _logits(q_ref, keys_ref, w1q_ref, w1k_ref, b1_ref,
                           w2_ref, b2_ref, tanh_dtype).astype(out_ref.dtype)


def _bahdanau_kernel_masked(q_ref, keys_ref, bias_ref, w1q_ref, w1k_ref,
                            b1_ref, w2_ref, b2_ref, out_ref, *, tanh_dtype):
    logits = _logits(q_ref, keys_ref, w1q_ref, w1k_ref, b1_ref, w2_ref,
                     b2_ref, tanh_dtype)
    # Additive bias: 0 where visible, -inf where masked (logits are finite).
    out_ref[...] = (logits + bias_ref[...]).astype(out_ref.dtype)


# ----------------------------------------------------------------------------
# One-time parameter / keys preparation (hoist out of the per-decode-step call)
# ----------------------------------------------------------------------------
def prepare_params(w1, b1, w2, b2, query_size, weight_dtype=jnp.bfloat16):
    """Split the concat-weight, transpose so proj is the lane axis, cast the
    matmul weights to bf16 (MXU native on v5e/v6e/v7x) and zero-pad proj to a
    multiple of 128 for dense MXU columns / lane-dense intermediates.
    Torch layouts: w1 (proj, Q+K), b1 (proj,), w2 (1, proj), b2 (1,)."""
    proj = w1.shape[0]
    p_pad = max(128, ((proj + 127) // 128) * 128)
    w1q = jnp.asarray(w1[:, :query_size].T, weight_dtype)    # (Q, P)
    w1k = jnp.asarray(w1[:, query_size:].T, weight_dtype)    # (K, P)
    b1r = jnp.asarray(b1, jnp.float32).reshape(1, proj)      # epilogue stays f32
    w2r = jnp.asarray(w2, jnp.float32).reshape(1, proj)
    if p_pad != proj:
        padw = ((0, 0), (0, p_pad - proj))
        w1q = jnp.pad(w1q, padw)     # zero columns -> tanh(0)*0 = 0 contribution
        w1k = jnp.pad(w1k, padw)
        b1r = jnp.pad(b1r, padw)
        w2r = jnp.pad(w2r, padw)
    b2r = jnp.asarray(b2, jnp.float32).reshape(1, 1)
    return w1q, w1k, b1r, w2r, b2r


def prepare_keys(keys, compute_dtype=jnp.bfloat16):
    """Optional one-time prep for decode loops: store keys in bf16 in HBM so
    every pointer step streams half the bytes (the kernel is HBM-bound on the
    keys stream for realistic proj sizes). The kernel also accepts f32 keys."""
    return jnp.asarray(keys, compute_dtype)


# ----------------------------------------------------------------------------
# Tiling / VMEM budgeting
# ----------------------------------------------------------------------------
def _vmem_capacity_bytes():
    try:
        return int(pltpu.get_tpu_info().vmem_capacity_bytes)
    except Exception:
        return 64 << 20   # conservative default = v7x per-TensorCore VMEM


def _default_tanh_dtype():
    """bf16 tanh on v6e/v7x (bf16 EUP, ~2x throughput); f32 on v5e and older
    (no bf16 VPU/EUP -> a bf16 epilogue would only add conversions)."""
    try:
        kind = jax.devices()[0].device_kind.lower()
    except Exception:
        return jnp.float32
    for old in ("v2", "v3", "v4", "v5"):
        if old in kind:
            return jnp.float32
    return jnp.bfloat16


def _pick_tiles(B, S, Q, K, P, key_itemsize, has_mask):
    """Pick (TB, TS, vmem_limit_bytes) from a *full* per-step VMEM footprint:
    double-buffered keys tile + f32 pre-activation + tanh copy + out/bias tiles
    + resident (double-buffered) weights, against the generation's VMEM."""
    cap = _vmem_capacity_bytes()
    budget = max(8 << 20, int(cap * 0.45))

    # Resident weights (bf16) + b1/w2 rows (f32), x2 pipeline buffers, + slack.
    fixed = 2 * ((Q + K) * P * 2 + 2 * P * 4) + (2 << 20)

    # Cost per (batch, seq) element of a tile.
    per_row = (2 * K * key_itemsize       # keys tile, double-buffered
               + P * 4                    # f32 (TB*TS, P) pre-activation
               + P * 2                    # bf16 tanh copy (upper bound)
               + 2 * 4                    # f32 out tile, double-buffered
               + (2 * 4 if has_mask else 0))
    max_rows = max((budget - fixed) // per_row, 8 * 128)

    tb_min = B if B <= 8 else 8
    if S <= 128:
        ts = S                                           # single full-S block
    else:
        ts = min(((S + 127) // 128) * 128, 2048)          # lane-dense multiples
        while ts > 128 and tb_min * ts > max_rows:
            ts -= 128

    if B <= 8:
        tb = B
    else:
        tb = (max_rows // max(ts, 1)) // 8 * 8
        tb = max(8, min(tb, ((B + 7) // 8) * 8, 1024))

    footprint = fixed + tb * ts * per_row + 4 * tb * Q * key_itemsize
    vmem_limit = int(min(cap * 0.85, max(32 << 20, 2 * footprint)))
    return tb, ts, vmem_limit


# ----------------------------------------------------------------------------
# Public wrapper
# ----------------------------------------------------------------------------
def bahdanau_pointer(query, keys, prepared_params, attn_mask=None):
    """query: (B, Q); keys: (B, S, K) (ideally pre-cast via prepare_keys);
    prepared_params from prepare_params(). Returns (B, S) float32 logits with
    masked positions = -inf."""
    w1q, w1k, b1r, w2r, b2r = prepared_params
    B, Q = query.shape
    _, S, K = keys.shape
    P = w1q.shape[1]
    wdt = w1q.dtype

    q = query.astype(wdt)   # tiny; keeps the q matmul on the native bf16 MXU path

    has_mask = attn_mask is not None
    TB, TS, vmem_limit = _pick_tiles(B, S, Q, K, P, keys.dtype.itemsize, has_mask)
    grid = (pl.cdiv(B, TB), pl.cdiv(S, TS))

    q_spec = pl.BlockSpec((TB, Q), lambda i, j: (i, 0))
    k_spec = pl.BlockSpec((TB, TS, K), lambda i, j: (i, j, 0))
    w1q_spec = pl.BlockSpec((Q, P), lambda i, j: (0, 0))   # VMEM-resident
    w1k_spec = pl.BlockSpec((K, P), lambda i, j: (0, 0))
    b1_spec = pl.BlockSpec((1, P), lambda i, j: (0, 0))
    w2_spec = pl.BlockSpec((1, P), lambda i, j: (0, 0))
    b2_spec = pl.BlockSpec(memory_space=pltpu.MemorySpace.SMEM)
    out_spec = pl.BlockSpec((TB, TS), lambda i, j: (i, j))

    tanh_dtype = _default_tanh_dtype()

    wbytes = (w1q.size + w1k.size) * jnp.dtype(wdt).itemsize + (b1r.size + w2r.size) * 4
    cost = pl.CostEstimate(
        flops=int(2 * B * S * P * (K + 1) + 2 * B * Q * P),
        transcendentals=int(B * S * P),
        bytes_accessed=int(keys.size * keys.dtype.itemsize
                           + q.size * jnp.dtype(wdt).itemsize
                           + wbytes + B * S * 4
                           + (B * S * 4 if has_mask else 0)))

    compiler_params = pltpu.CompilerParams(
        dimension_semantics=("parallel", "parallel"),
        vmem_limit_bytes=vmem_limit)
    out_shape = jax.ShapeDtypeStruct((B, S), jnp.float32)

    if not has_mask:
        # Specialized path: no bias DMA, no extra add.
        return pl.pallas_call(
            partial(_bahdanau_kernel, tanh_dtype=tanh_dtype),
            out_shape=out_shape,
            grid=grid,
            in_specs=[q_spec, k_spec, w1q_spec, w1k_spec, b1_spec, w2_spec,
                      b2_spec],
            out_specs=out_spec,
            compiler_params=compiler_params,
            cost_estimate=cost,
        )(q, keys, w1q, w1k, b1r, w2r, b2r)

    # Additive mask bias: 0 where visible, -inf where masked.
    bias = jnp.where(jnp.broadcast_to(attn_mask, (B, S)),
                     jnp.float32(-jnp.inf), jnp.float32(0.0))
    bias_spec = pl.BlockSpec((TB, TS), lambda i, j: (i, j))
    return pl.pallas_call(
        partial(_bahdanau_kernel_masked, tanh_dtype=tanh_dtype),
        out_shape=out_shape,
        grid=grid,
        in_specs=[q_spec, k_spec, bias_spec, w1q_spec, w1k_spec, b1_spec,
                  w2_spec, b2_spec],
        out_specs=out_spec,
        compiler_params=compiler_params,
        cost_estimate=cost,
    )(q, keys, bias, w1q, w1k, b1r, w2r, b2r)


# ----------------------------------------------------------------------------
# Reference + self-test
# ----------------------------------------------------------------------------
def _reference(query, keys, params, attn_mask=None):
    w1, b1, w2, b2 = params
    B, S, _ = keys.shape
    qe = jnp.broadcast_to(query[:, None, :], (B, S, query.shape[-1]))
    x = jnp.concatenate([qe, keys], axis=-1)
    h = jnp.tanh(x @ w1.T + b1)
    logits = (h @ w2.T + b2)[..., 0]
    if attn_mask is not None:
        logits = jnp.where(jnp.broadcast_to(attn_mask, logits.shape),
                           float("-inf"), logits)
    return logits


if __name__ == "__main__":
    B, S = 2, 8
    query_size, key_size, proj_size = 32, 32, 32

    key = jax.random.PRNGKey(0)
    k_q, k_k, k_w1, k_b1, k_w2, k_b2 = jax.random.split(key, 6)

    query = jax.random.normal(k_q, (B, query_size), jnp.float32)
    keys = jax.random.normal(k_k, (B, S, key_size), jnp.float32)

    # Deterministic params (torch Linear default: U(-1/sqrt(fan_in), 1/sqrt(fan_in)))
    fan1 = query_size + key_size
    bnd1 = 1.0 / math.sqrt(fan1)
    w1 = jax.random.uniform(k_w1, (proj_size, fan1), jnp.float32, -bnd1, bnd1)
    b1 = jax.random.uniform(k_b1, (proj_size,), jnp.float32, -bnd1, bnd1)
    bnd2 = 1.0 / math.sqrt(proj_size)
    w2 = jax.random.uniform(k_w2, (1, proj_size), jnp.float32, -bnd2, bnd2)
    b2 = jax.random.uniform(k_b2, (1,), jnp.float32, -bnd2, bnd2)
    params = (w1, b1, w2, b2)

    # One-time prep hoisted out of the per-decode-step path.
    prepared = prepare_params(w1, b1, w2, b2, query_size)   # bf16, proj padded
    keys_prep = prepare_keys(keys)                          # bf16 keys in HBM

    # Mask out the last two key positions of batch 1.
    attn_mask = jnp.zeros((B, S), bool).at[1, S - 2:].set(True)

    # Masked path.
    out = jax.block_until_ready(bahdanau_pointer(query, keys_prep, prepared,
                                                 attn_mask))
    ref = _reference(query, keys, params, attn_mask)
    finite = jnp.isfinite(ref)
    ok_vals = jnp.allclose(jnp.where(finite, out, 0.0),
                           jnp.where(finite, ref, 0.0), atol=5e-2, rtol=5e-2)
    ok_mask = bool(jnp.all(jnp.where(finite, True, jnp.isneginf(out))))
    assert ok_vals and ok_mask, "Pallas output mismatch vs reference (masked)"

    # Unmasked specialized path.
    out_nm = jax.block_until_ready(bahdanau_pointer(query, keys_prep, prepared))
    ref_nm = _reference(query, keys, params)
    assert jnp.allclose(out_nm, ref_nm, atol=5e-2, rtol=5e-2), \
        "Pallas output mismatch vs reference (unmasked)"

    print("KERNEL_OK")
</pallas_src>

<mosaic_0001>
module attributes {stable_mosaic.version = 11 : i64} {
  func.func @_bahdanau_kernel_masked(%arg0: i32, %arg1: i32, %arg2: memref<2x32xbf16, #tpu.memory_space<vmem>>, %arg3: memref<2x8x32xbf16, #tpu.memory_space<vmem>>, %arg4: memref<2x8xf32, #tpu.memory_space<vmem>>, %arg5: memref<32x128xbf16, #tpu.memory_space<vmem>>, %arg6: memref<32x128xbf16, #tpu.memory_space<vmem>>, %arg7: memref<1x128xf32, #tpu.memory_space<vmem>>, %arg8: memref<1x128xf32, #tpu.memory_space<vmem>>, %arg9: memref<1x1xf32, #tpu.memory_space<smem>>, %arg10: memref<2x8xf32, #tpu.memory_space<vmem>>) attributes {dimension_semantics = [#tpu.dimension_semantics<parallel>, #tpu.dimension_semantics<parallel>], iteration_bounds = array<i64: 1, 1>, scalar_prefetch = 0 : i64, scratch_operands = 0 : i64, tpu.core_type = #tpu.core_type<tc>, window_params = [{transform_indices = @transform_0, window_bounds = array<i64: 2, 32>}, {transform_indices = @transform_1, window_bounds = array<i64: 2, 8, 32>}, {transform_indices = @transform_2, window_bounds = array<i64: 2, 8>}, {pipeline_mode = #tpu.pipeline_mode<synchronous>, transform_indices = @transform_3, window_bounds = array<i64: 32, 128>}, {pipeline_mode = #tpu.pipeline_mode<synchronous>, transform_indices = @transform_4, window_bounds = array<i64: 32, 128>}, {pipeline_mode = #tpu.pipeline_mode<synchronous>, transform_indices = @transform_5, window_bounds = array<i64: 1, 128>}, {pipeline_mode = #tpu.pipeline_mode<synchronous>, transform_indices = @transform_6, window_bounds = array<i64: 1, 128>}, {transform_indices = @transform_7, window_bounds = array<i64: 1, 1>}, {transform_indices = @transform_8, window_bounds = array<i64: 2, 8>}]} {
    %c0 = arith.constant 0 : index
    %c0_0 = arith.constant 0 : index
    %0 = vector.load %arg2[%c0, %c0_0] : memref<2x32xbf16, #tpu.memory_space<vmem>>, vector<2x32xbf16>
    %c0_1 = arith.constant 0 : index
    %c0_2 = arith.constant 0 : index
    %1 = vector.load %arg5[%c0_1, %c0_2] : memref<32x128xbf16, #tpu.memory_space<vmem>>, vector<32x128xbf16>
    %cst = arith.constant dense<0.000000e+00> : vector<2x128xf32>
    %2 = tpu.matmul %0, %1, %cst {dimension_numbers = #tpu.dot_dimension_numbers<[1], [0], [0], [1], [0, 0, 1, 1], [], []>} : vector<2x32xbf16>, vector<32x128xbf16>, vector<2x128xf32> -> vector<2x128xf32>
    %c0_3 = arith.constant 0 : index
    %c0_4 = arith.constant 0 : index
    %3 = vector.load %arg7[%c0_3, %c0_4] : memref<1x128xf32, #tpu.memory_space<vmem>>, vector<1x128xf32>
    %4 = vector.broadcast %3 : vector<1x128xf32> to vector<2x128xf32>
    %5 = arith.addf %2, %4 : vector<2x128xf32>
    %c0_5 = arith.constant 0 : index
    %c0_6 = arith.constant 0 : index
    %c0_7 = arith.constant 0 : index
    %6 = vector.load %arg3[%c0_5, %c0_6, %c0_7] : memref<2x8x32xbf16, #tpu.memory_space<vmem>>, vector<2x8x32xbf16>
    %7 = vector.shape_cast %6 : vector<2x8x32xbf16> to vector<16x32xbf16>
    %c0_8 = arith.constant 0 : index
    %c0_9 = arith.constant 0 : index
    %8 = vector.load %arg6[%c0_8, %c0_9] : memref<32x128xbf16, #tpu.memory_space<vmem>>, vector<32x128xbf16>
    %cst_10 = arith.constant dense<0.000000e+00> : vector<16x128xf32>
    %9 = tpu.matmul %7, %8, %cst_10 {dimension_numbers = #tpu.dot_dimension_numbers<[1], [0], [0], [1], [0, 0, 1, 1], [], []>} : vector<16x32xbf16>, vector<32x128xbf16>, vector<16x128xf32> -> vector<16x128xf32>
    %10 = vector.shape_cast %9 : vector<16x128xf32> to vector<2x8x128xf32>
    %11 = vector.shape_cast %5 : vector<2x128xf32> to vector<2x1x128xf32>
    %12 = vector.broadcast %11 : vector<2x1x128xf32> to vector<2x8x128xf32>
    %13 = arith.addf %10, %12 : vector<2x8x128xf32>
    %14 = arith.truncf %13 : vector<2x8x128xf32> to vector<2x8x128xbf16>
    %15 = math.tanh %14 : vector<2x8x128xbf16>
    %16 = arith.extf %15 : vector<2x8x128xbf16> to vector<2x8x128xf32>
    %c0_11 = arith.constant 0 : index
    %c0_12 = arith.constant 0 : index
    %17 = vector.load %arg8[%c0_11, %c0_12] : memref<1x128xf32, #tpu.memory_space<vmem>>, vector<1x128xf32>
    %18 = vector.shape_cast %17 : vector<1x128xf32> to vector<1x1x128xf32>
    %19 = vector.broadcast %18 : vector<1x1x128xf32> to vector<2x8x128xf32>
    %20 = arith.mulf %16, %19 : vector<2x8x128xf32>
    %cst_13 = arith.constant dense<0.000000e+00> : vector<2x8xf32>
    %21 = vector.multi_reduction <add>, %20, %cst_13 [2] : vector<2x8x128xf32> to vector<2x8xf32>
    %c0_14 = arith.constant 0 : index
    %c0_15 = arith.constant 0 : index
    %22 = memref.load %arg9[%c0_14, %c0_15] : memref<1x1xf32, #tpu.memory_space<smem>>
    %23 = vector.broadcast %22 : f32 to vector<2x8xf32>
    %24 = arith.addf %21, %23 : vector<2x8xf32>
    %c0_16 = arith.constant 0 : index
    %c0_17 = arith.constant 0 : index
    %25 = vector.load %arg4[%c0_16, %c0_17] : memref<2x8xf32, #tpu.memory_space<vmem>>, vector<2x8xf32>
    %26 = arith.addf %24, %25 : vector<2x8xf32>
    %c0_18 = arith.constant 0 : index
    %c0_19 = arith.constant 0 : index
    %27 = vector.load %arg10[%c0_18, %c0_19] : memref<2x8xf32, #tpu.memory_space<vmem>>, vector<2x8xf32>
    tpu.vector_store %arg10[%c0_18, %c0_19], %26 {strides = array<i32>} : memref<2x8xf32, #tpu.memory_space<vmem>>, vector<2x8xf32>,
    return
  }
  func.func @transform_0(%arg0: i32, %arg1: i32) -> (i32, i32) {
    %c0_i32 = arith.constant 0 : i32
    %c0_i32_0 = arith.constant 0 : i32
    return %arg0, %c0_i32 : i32, i32
  }
  func.func @transform_1(%arg0: i32, %arg1: i32) -> (i32, i32, i32) {
    %c0_i32 = arith.constant 0 : i32
    %c0_i32_0 = arith.constant 0 : i32
    return %arg0, %arg1, %c0_i32 : i32, i32, i32
  }
  func.func @transform_2(%arg0: i32, %arg1: i32) -> (i32, i32) {
    %c0_i32 = arith.constant 0 : i32
    return %arg0, %arg1 : i32, i32
  }
  func.func @transform_3(%arg0: i32, %arg1: i32) -> (i32, i32) {
    %c0_i32 = arith.constant 0 : i32
    %c0_i32_0 = arith.constant 0 : i32
    %c0_i32_1 = arith.constant 0 : i32
    return %c0_i32, %c0_i32_0 : i32, i32
  }
  func.func @transform_4(%arg0: i32, %arg1: i32) -> (i32, i32) {
    %c0_i32 = arith.constant 0 : i32
    %c0_i32_0 = arith.constant 0 : i32
    %c0_i32_1 = arith.constant 0 : i32
    return %c0_i32, %c0_i32_0 : i32, i32
  }
  func.func @transform_5(%arg0: i32, %arg1: i32) -> (i32, i32) {
    %c0_i32 = arith.constant 0 : i32
    %c0_i32_0 = arith.constant 0 : i32
    %c0_i32_1 = arith.constant 0 : i32
    return %c0_i32, %c0_i32_0 : i32, i32
  }
  func.func @transform_6(%arg0: i32, %arg1: i32) -> (i32, i32) {
    %c0_i32 = arith.constant 0 : i32
    %c0_i32_0 = arith.constant 0 : i32
    %c0_i32_1 = arith.constant 0 : i32
    return %c0_i32, %c0_i32_0 : i32, i32
  }
  func.func @transform_7(%arg0: i32, %arg1: i32) -> (i32, i32) {
    %c0_i32 = arith.constant 0 : i32
    %c0_i32_0 = arith.constant 0 : i32
    %c0_i32_1 = arith.constant 0 : i32
    return %c0_i32, %c0_i32_0 : i32, i32
  }
  func.func @transform_8(%arg0: i32, %arg1: i32) -> (i32, i32) {
    %c0_i32 = arith.constant 0 : i32
    return %arg0, %arg1 : i32, i32
  }
}

</mosaic_0001>

<bundles_post_ra>
// kernel: tpu_custom_call.1
= control target key start
LH: loop header
LB: loop body
LE: loop exit
PB: predicated region body
PF: predicated region fallthrough
CT: control target
= control target key end

     0   :  { %14 = vsyncpa [#allocation4], 0  ;;  %s596_s0 = inlined_call_operand.hbm [shape: bf16[2,32], index: 0, kind: input, shape index: {}]   ;;  %s597_s1 = inlined_call_operand.hbm [shape: bf16[2,8,32], index: 1, kind: input, shape index: {}]   ;;  %s598_s2 = inlined_call_operand.vmem [shape: f32[2,8], index: 2, kind: input, shape index: {}]   ;;  %s599_s3 = inlined_call_operand.hbm [shape: bf16[32,128], index: 3, kind: input, shape index: {}]   ;;  %s600_s4 = inlined_call_operand.vmem [shape: bf16[32,128], index: 4, kind: input, shape index: {}]   ;;  %s601_s5 = inlined_call_operand.vmem [shape: f32[1,128], index: 5, kind: input, shape index: {}]   ;;  %s602_s6 = inlined_call_operand.vmem [shape: f32[1,128], index: 6, kind: input, shape index: {}]   ;;  %s603_s7 = inlined_call_operand.<no memory space> [shape: f32[1,1], index: 7, kind: input, shape index: {}]   ;;  %s604_s8 = inlined_call_operand.hbm [shape: f32[2,8], index: 8, kind: output, shape index: {}]  }
   0x1   :  { %15 = vsyncpa [#allocation7], 0 }
   0x2   :  { %16 = vsyncpa [#allocation5], 0  ;;  %s469_s27 = smov [#allocation6]   ;;  %s375_s9 = scalar_lea.hbm %s597_s1, 128 }
   0x3   :  { %s32_s28 = sshll.u32 %s469_s27, 4  ;;  %p376_p0 = scmp.ne.s32.totalorder %s597_s1, %s375_s9  ;;  %s33_s28 = int_to_ptr.vmem [resolvable:$true] %s32_s28 }
   0x4   :  { %p379_p1 = scmp.lt.u32.totalorder %s375_s9, %s597_s1 }
   0x6   :  { %p381_p2 = pnand %p379_p1, %p376_p0 }
   0x8   :  { %384 = shalt.err (!%p381_p2)
}
   0x9   :  { %s385_s14 = scalar_lea.vmem %s33_s28, 128  ;;  %p390_p4 = scmp.lt.s32.totalorder %s33_s28, %s33_s28 }
   0xa   :  { %p386_p3 = scmp.ne.s32.totalorder %s33_s28, %s385_s14  ;;  %p391_p5 = scmp.lt.s32.totalorder %s385_s14, %s385_s14 }
   0xc   :  { %p392_p6 = por %p391_p5, %p390_p4 }
   0xe   :  { %p393_p7 = pnand %p392_p6, %p386_p3 }
  0x10   :  { %396 = shalt.err (!%p393_p7)
}
  0x11   :  { %s470_s15 = smov 64   ;;  %s471_s16 = smov 4  }
  0x12   :  { %38 = dma.hbm_to_vmem [thread:$0]  %s597_s1, 128, %s33_s28, [#allocation7], %s470_s15, %s470_s15, %s471_s16  }
  0x13   :  { %s472_s19 = smov [#allocation3]   ;;  %s473_s21 = smov [#allocation8]  }
  0x14   :  { %s23_s20 = sshll.u32 %s472_s19, 4  ;;  %s46_s22 = sshll.u32 %s473_s21, 4  ;;  %s24_s20 = int_to_ptr.vmem [resolvable:$true] %s23_s20  ;;  %s47_s22 = int_to_ptr.vmem [resolvable:$true] %s46_s22 }
  0x15   :  { %s397_s25 = scalar_lea.hbm %s596_s0, 16 }
  0x16   :  { %p398_p8 = scmp.ne.s32.totalorder %s596_s0, %s397_s25  ;;  %p401_p9 = scmp.lt.u32.totalorder %s397_s25, %s596_s0 }
  0x18   :  { %p403_p10 = pnand %p401_p9, %p398_p8 }
  0x1a   :  { %406 = shalt.err (!%p403_p10)
}
  0x1b   :  { %s407_s1 = scalar_lea.vmem %s24_s20, 16  ;;  %s411_s28 = scalar_lea.vmem %s24_s20, 32 }
  0x1c   :  { %p408_p11 = scmp.ne.s32.totalorder %s24_s20, %s407_s1  ;;  %p412_p12 = scmp.lt.s32.totalorder %s24_s20, %s24_s20 }
  0x1d   :  { %p413_p13 = scmp.lt.s32.totalorder %s411_s28, %s407_s1 }
  0x1f   :  { %p414_p0 = por %p413_p13, %p412_p12 }
  0x21   :  { %p415_p1 = pnand %p414_p0, %p408_p11 }
  0x23   :  { %418 = shalt.err (!%p415_p1)
}
  0x24   :  { %26 = dma.hbm_to_vmem [thread:$0]  %s596_s0, 16, %s24_s20, [#allocation4]  }
  0x25   :  { %s419_s13 = scalar_lea.hbm %s599_s3, 256 }
  0x26   :  { %p420_p2 = scmp.ne.s32.totalorder %s599_s3, %s419_s13  ;;  %p423_p3 = scmp.lt.u32.totalorder %s419_s13, %s599_s3 }
  0x28   :  { %p425_p4 = pnand %p423_p3, %p420_p2 }
  0x2a   :  { %428 = shalt.err (!%p425_p4)
}
  0x2b   :  { %s429_s21 = scalar_lea.vmem %s47_s22, 256  ;;  %p434_p6 = scmp.lt.s32.totalorder %s47_s22, %s47_s22 }
  0x2c   :  { %p430_p5 = scmp.ne.s32.totalorder %s47_s22, %s429_s21  ;;  %p435_p7 = scmp.lt.s32.totalorder %s429_s21, %s429_s21 }
  0x2e   :  { %p436_p8 = por %p435_p7, %p434_p6 }
  0x30   :  { %p437_p9 = pnand %p436_p8, %p430_p5 }
  0x32   :  { %440 = shalt.err (!%p437_p9)
}
  0x33   :  { %52 = dma.hbm_to_vmem [thread:$0]  %s599_s3, 256, %s47_s22, [#allocation7], %s470_s15, %s470_s15, %s471_s16  }
  0x34   :  { %463 = dma.done.wait [#allocation4], 16  }
  0x35   :  { %464 = vsyncadd [#allocation4], 4294967280 }
  0x36   :  { %465 = dma.done.wait [#allocation7], 384  }
  0x37   :  { %466 = vsyncadd [#allocation7], 4294966912  ;;  %v474_v0 = vmov 0.0   ;;  %vm475_vm0 = vmmov 0   ;;  %v366_v1 = vld [vmem:[#allocation8] sm:$0xff]   ;;  %v367_v2 = vld [vmem:[#allocation8 + $0x8] sm:$0xff]   ;;  %v210_v7 = vlaneseq  ;;  %v261_v46 = vstv %s603_s7 }
  0x38   :  { %338 = vmatprep.subr.bf16.mxu0 %v474_v0  ;;  %346 = vmatprep.subr.bf16.mxu1 %v474_v0  ;;  %v368_v3 = vld [vmem:[%s600_s4] sm:$0xff]   ;;  %v369_v4 = vld [vmem:[%s600_s4 + $0x8] sm:$0xff]   ;;  %vm95_vm1 = vcmask 261120   ;;  %v476_v14 = vmov 1966171168   ;;  %v477_v45 = vmov 0  }
  0x39   :  { %342 = vmatprep.mubr.msk.bf16.mxu0 %vm475_vm0, %v474_v0  ;;  %350 = vmatprep.mubr.msk.bf16.mxu1 %vm475_vm0, %v474_v0  ;;  %v71_v5 = vld [vmem:[#allocation3] sm:$0x1]  ;;  %v370_v6 = vld [vmem:[#allocation6] sm:$0xff]   ;;  %v211_v8 = vshrl.u32 %v210_v7, 7  ;;  %v208_v15 = vunpack.c.l.s4 %v476_v14  ;;  %v293_v55 = vand.u32 127, %v210_v7  ;;  %vm302_vm2 = vcmask 1041409  }
  0x3a   :  { %339 = vmatpush3.bf16.msra.mxu0 %v366_v1  ;;  %347 = vmatpush3.bf16.msra.mxu1 %v368_v3  ;;  %v264_v10 = vld [vmem:[%s598_s2] sm:$0x3]  ;;  %vm305_vm3 = vcmask 58368  }
  0x3b   :  { %340 = vmatprep.subr.bf16.mxu0 %v474_v0  ;;  %348 = vmatprep.subr.bf16.mxu1 %v474_v0  ;;  %v231_v9 = vsub.s32 0, %v211_v8  ;;  %v275_v11 = vsub.s32 1, %v211_v8  ;;  %v209_v16 = vunpack.c.0.s8 %v208_v15  ;;  %v323_v17 = vld [vmem:[%s601_s5] ss:$0 sm:$0xff]  ;;  %v296_v56 = vsub.s32 %v293_v55, %v211_v8 }
  0x3c   :  { %v331_v39 = vld [vmem:[%s602_s6] ss:$0 sm:$0xff]  ;;  %364 = vset.pattern.permute.xlu0 %v477_v45  ;;  %365 = vset.pattern.permute.xlu1 %v477_v45  ;;  %s478_s6 = smov [#allocation9]  }
  0x3d   :  { %v269_v12 = vrot.slane %v264_v10, %v231_v9  ;;  %v276_v13 = vrot.slane %v264_v10, %v275_v11  ;;  %v212_v18 = vsub.s32 %v209_v16, %v211_v8  ;;  %s313_s29 = sshll.u32 %s478_s6, 4  ;;  %s314_s29 = int_to_ptr.vmem [resolvable:$true] %s313_s29 }
  0x3e   :  { %341 = vmatpush3.bf16.msra.mxu0 %v367_v2  ;;  %349 = vmatpush3.bf16.msra.mxu1 %v369_v4  ;;  %s441_s7 = scalar_lea.vmem %s314_s29, 32  ;;  %p446_p11 = scmp.lt.s32.totalorder %s314_s29, %s314_s29 }
  0x3f   :  { %271 = vbcast.lane.b32.xlu1 %v269_v12, 256  ;;  %p442_p10 = scmp.ne.s32.totalorder %s314_s29, %s441_s7  ;;  %p447_p12 = scmp.lt.s32.totalorder %s441_s7, %s441_s7 }
  0x41   :  { %343 = vmatmul.mubr.msk.bf16.vlgmr.msra.gmra.mrb[0].mxu0 %vm95_vm1, %v71_v5  ;;  %351 = vmatmul.mubr.msk.bf16.vlgmr.msra.gmra.mrb[0].mxu1 %vm95_vm1, %v370_v6  ;;  %p448_p13 = por %p447_p12, %p446_p11 }
  0x43   :  { %278 = vbcast.lane.b32.xlu1 %v276_v13, 256  ;;  %p449_p0 = pnand %p448_p13, %p442_p10 }
  0xb1   :  { %v272_v47 = vpop.permute.xlu1 %271 }
  0xb5   :  { %v279_v52 = vpop.permute.xlu1 %278 }
 0x114   :  { %v133_v19 = vpop.f32.mrb[0].mxu0  ;;  %v199_v23 = vpop.f32.mrb[0].mxu1 }
 0x115   :  { %v134_v20 = vadd.f32 %v323_v17, %v133_v19  ;;  %v344_v21 = vpop.f32.mrb[1].mxu0  ;;  %v352_v26 = vpop.f32.mrb[1].mxu1 }
 0x116   :  { %v136_v22 = vpop.f32.mrb[2].mxu0  ;;  %v202_v27 = vpop.f32.mrb[2].mxu1 }
 0x117   :  { %v213_v24 = vrot.slane %v134_v20, %v212_v18  ;;  %v345_v25 = vpop.f32.mrb[3].mxu0  ;;  %v353_v30 = vpop.f32.mrb[3].mxu1 }
 0x119   :  { %v214_v28 = vcombine.high %v213_v24, %v213_v24  ;;  %v221_v29 = vrot.slane %v213_v24, %v212_v18 }
 0x11b   :  { %v232_v31 = vrot.slane %v221_v29, %v231_v9  ;;  %v228_v32 = vrot.slane %v214_v28, %v212_v18 }
 0x11d   :  { %v239_v33 = vadd.f32 %v232_v31, %v199_v23  ;;  %v236_v34 = vrot.slane %v228_v32, %v231_v9 }
 0x11f   :  { %v241_v35 = vpack.c.bf16 %v239_v33, %v239_v33  ;;  %v240_v36 = vadd.f32 %v236_v34, %v202_v27 }
 0x121   :  { %371 = vtanh.bf16 %v241_v35  ;;  %v242_v37 = vpack.c.bf16 %v240_v36, %v240_v36 }
 0x123   :  { %373 = vtanh.bf16 %v242_v37 }
 0x12c   :  { %v372_v38 = vpop.eup %371 }
 0x12d   :  { %v245_v40 = vunpack.c.l.bf16 %v372_v38 }
 0x12e   :  { %v374_v41 = vpop.eup %373 }
 0x12f   :  { %v254_v42 = vmul.f32 %v331_v39, %v245_v40  ;;  %v246_v43 = vunpack.c.l.bf16 %v374_v41 }
 0x131   :  { %256 = vadd.xlane.f32.xlu0 %v254_v42  ;;  %v255_v44 = vmul.f32 %v331_v39, %v246_v43 }
 0x135   :  { %258 = vadd.xlane.f32.xlu0 %v255_v44 }
 0x1be   :  { %v257_v48 = vpop.xlane.xlu0 %256 }
 0x1bf   :  { %v262_v49 = vadd.f32 %v261_v46, %v257_v48 }
 0x1c1   :  { %v282_v50 = vadd.f32 %v272_v47, %v262_v49 }
 0x1c2   :  { %v259_v51 = vpop.xlane.xlu0 %258 }
 0x1c3   :  { %v263_v53 = vadd.f32 %v261_v46, %v259_v51  ;;  %287 = vperm.xlu0 %364, %v282_v50  }
 0x1c5   :  { %v283_v54 = vadd.f32 %v279_v52, %v263_v53 }
 0x1c7   :  { %290 = vperm.xlu1 %365, %v283_v54  }
 0x242   :  { %v288_v57 = vpop.permute.xlu0 %287 }
 0x243   :  { %v297_v59 = vrot.slane %v288_v57, %v296_v56 }
 0x246   :  { %v291_v58 = vpop.permute.xlu1 %290 }
 0x247   :  { %v301_v60 = vrot.slane %v291_v58, %v296_v56 }
 0x249   :  { %v303_v61 = vsel %vm302_vm2, %v301_v60, %v297_v59 }
 0x24a   :  { %306 = vst.msk [vmem:[#allocation9] sm:$0x3] %vm305_vm3, %v303_v61 }
 0x24b   :  { %452 = shalt.err (!%p449_p0)
}
 0x24c   :  { %s453_s28 = scalar_lea.hbm %s604_s8, 32 }
 0x24d   :  { %p454_p1 = scmp.ne.s32.totalorder %s604_s8, %s453_s28  ;;  %p457_p2 = scmp.lt.u32.totalorder %s453_s28, %s604_s8 }
 0x24f   :  { %p459_p3 = pnand %p457_p2, %p454_p1 }
 0x251   :  { %462 = shalt.err (!%p459_p3)
}
 0x252   :  { %316 = dma.vmem_to_hbm [thread:$0]  %s314_s29, 32, %s604_s8, [#allocation5]  }
 0x253   :  { %467 = dma.done.wait [#allocation5], 32  }
 0x254   :  { %468 = vsyncadd [#allocation5], 4294967264 }
 0x255   :  { %320 = vsyncpa [#allocation4], 1 }
 0x256   :  { %321 = vsyncpa [#allocation7], 1 }
 0x257   :  { %322 = vsyncpa [#allocation5], 1 }

</bundles_post_ra>
